<compile_context>
chip_gen: v7x
topology: tpu7x:2x2x1
jax: 0.10.0
libtpu: 0.0.40
codegen_flags: <defaults>
</compile_context>

<pallas_src>
import math

import numpy as np
import jax
import jax.numpy as jnp
from jax.experimental import pallas as pl
from jax.experimental.pallas import tpu as pltpu  # noqa: F401  (kept per instructions)

# ---------------- model config ("args") ----------------
B, S = 2, 16          # batch, seq_len
ENC_IN = 4            # args.enc_in
D_MODEL = 32          # args.d_model
N_HEADS = 4           # args.n_heads
UV = 16               # args.uv_size
QK = 8                # args.qk_size
OUT_SIZE = 4          # args.out_size
EPS = 1e-5            # LayerNorm eps (PyTorch default)

HUV = N_HEADS * UV    # 64  (all heads' u/v lanes)
HQK = N_HEADS * QK    # 32  (all heads' q/k/z lanes)

# ---------------- packed weight/constant slab layout (rows x 128 lanes, one DMA) ------
SLAB_W = 128


def _a8(x):
    return ((x + 7) // 8) * 8


R_WTOK = 0                       # (ENC_IN, 3*D)  [W_prev | W_center | W_next]
R_WUV = _a8(R_WTOK + ENC_IN)     # (D, 128)       [W_u | W_v]  lane-dense fused projection
R_WZ = _a8(R_WUV + D_MODEL)      # (D, HQK)       z projection
R_WO = _a8(R_WZ + D_MODEL)       # (HUV, D)       fused output projection
R_WP = _a8(R_WO + HUV)           # (D, OUT)       final projection
R_PE = _a8(R_WP + D_MODEL)       # (B*S, D)       positional enc tiled over batch
R_PPREV = _a8(R_PE + B * S)      # (B*S, B*S)     per-batch circular shift +1 (conv tap -1)
R_PNEXT = _a8(R_PPREV + B * S)   # (B*S, B*S)     per-batch circular shift -1 (conv tap +1)
R_SELB = _a8(R_PNEXT + B * S)    # (B*S, B*S)     broadcast each batch's last row to its rows
R_SEGQK = _a8(R_SELB + B * S)    # (HQK, H)       head-wise dot-product reduce
R_SEGUV = _a8(R_SEGQK + HQK)     # (H, HUV)       head -> uv-lane expansion
R_ESUM = _a8(R_SEGUV + N_HEADS)  # (B, B*S)       per-batch segment sum
R_ELAST = R_ESUM + B             # (B, B*S)       per-batch last-row selector
R_VEC = _a8(R_ELAST + B)         # 4 lane-packed bias/affine rows
SLAB_ROWS = _a8(R_VEC + 4)       # 352


def _silu(x):
    return x * jax.nn.sigmoid(x)


def _layernorm(x, g, b):
    mean = jnp.mean(x, axis=-1, keepdims=True)
    var = jnp.mean((x - mean) ** 2, axis=-1, keepdims=True)
    return (x - mean) * jax.lax.rsqrt(var + EPS) * g + b


# ---------------- Pallas kernel ----------------
def gau_forward_kernel(x_ref, slab_ref, out_ref):
    f32 = jnp.float32
    sl = slab_ref

    # --- static weight / constant views (all at lane 0, 8-row-aligned starts) ---
    wtok_cat = sl[R_WTOK:R_WTOK + ENC_IN, 0:3 * D_MODEL]        # (4, 96)
    w_uv = sl[R_WUV:R_WUV + D_MODEL, 0:2 * HUV]                 # (32, 128) [u | v]
    w_z = sl[R_WZ:R_WZ + D_MODEL, 0:HQK]                        # (32, 32)
    w_o = sl[R_WO:R_WO + HUV, 0:D_MODEL]                        # (64, 32)
    w_p = sl[R_WP:R_WP + D_MODEL, 0:OUT_SIZE]                   # (32, 4)
    pe = sl[R_PE:R_PE + B * S, 0:D_MODEL]                       # (32, 32)
    p_prev = sl[R_PPREV:R_PPREV + B * S, 0:B * S]               # (32, 32)
    p_next = sl[R_PNEXT:R_PNEXT + B * S, 0:B * S]               # (32, 32)
    sel_bc = sl[R_SELB:R_SELB + B * S, 0:B * S]                 # (32, 32)
    seg_qk = sl[R_SEGQK:R_SEGQK + HQK, 0:N_HEADS]               # (32, 4)
    seg_uv = sl[R_SEGUV:R_SEGUV + N_HEADS, 0:HUV]               # (4, 64)
    e_sum = sl[R_ESUM:R_ESUM + B, 0:B * S]                      # (2, 32)
    e_last = sl[R_ELAST:R_ELAST + B, 0:B * S]                   # (2, 32)

    # --- lane-packed bias / affine vectors (4 aligned rows, one load each) ---
    vq = sl[R_VEC + 0:R_VEC + 1, :]                             # [gq|bq|gk|bk]
    gq, bq = vq[:, 0:HQK], vq[:, HQK:2 * HQK]
    gk, bk = vq[:, 2 * HQK:3 * HQK], vq[:, 3 * HQK:4 * HQK]
    vl = sl[R_VEC + 1:R_VEC + 2, :]                             # [g1|b1|gn|bn]
    g1, b1 = vl[:, 0:D_MODEL], vl[:, D_MODEL:2 * D_MODEL]
    gn, bn = vl[:, 2 * D_MODEL:3 * D_MODEL], vl[:, 3 * D_MODEL:4 * D_MODEL]
    b_uv = sl[R_VEC + 2:R_VEC + 3, 0:2 * HUV]                   # [b_u|b_v]
    vb = sl[R_VEC + 3:R_VEC + 4, :]                             # [b_z|bo|bp]
    b_z = vb[:, 0:HQK]
    bo = vb[:, HQK:HQK + D_MODEL]
    bp = vb[:, HQK + D_MODEL:HQK + D_MODEL + OUT_SIZE]

    # --- DataEmbedding: circular Conv1d(k=3) as one wide matmul + 2 shift matmuls + PE ---
    x = x_ref[...]                                              # (B*S, ENC_IN)
    y = jnp.dot(x, wtok_cat, preferred_element_type=f32)        # (32, 96)
    x_emb = (jnp.dot(p_prev, y[:, 0:D_MODEL], preferred_element_type=f32)
             + y[:, D_MODEL:2 * D_MODEL]
             + jnp.dot(p_next, y[:, 2 * D_MODEL:3 * D_MODEL], preferred_element_type=f32)
             + pe)                                              # (32, 32)

    # --- fused [u|v] and z projections, all rows & all heads ---
    uv = _silu(jnp.dot(x_emb, w_uv, preferred_element_type=f32) + b_uv)     # (32, 128)
    u_all, v_all = uv[:, 0:HUV], uv[:, HUV:2 * HUV]
    z_all = _silu(jnp.dot(x_emb, w_z, preferred_element_type=f32) + b_z)    # (32, 32)

    # --- batch-vectorized multi-head attention (last query row of each batch) ---
    q_all = z_all * gq + bq                       # 1/sqrt(QK) folded into gq/bq at pack time
    k_all = z_all * gk + bk
    q_bc = jnp.dot(sel_bc, q_all, preferred_element_type=f32)              # (32, 32)
    s = jnp.dot(k_all * q_bc, seg_qk, preferred_element_type=f32)          # (32, 4)
    s = s - jnp.max(s, axis=0, keepdims=True)     # per-head shift, constant per batch -> exact
    e = jnp.exp(s)                                                          # (32, 4)
    a_exp = jnp.dot(e, seg_uv, preferred_element_type=f32)                  # (32, 64) unnorm.
    o_un = jnp.dot(e_sum, a_exp * v_all, preferred_element_type=f32)        # (2, 64)
    d_uv = jnp.dot(e_sum, a_exp, preferred_element_type=f32)                # (2, 64) denoms

    u_last = jnp.dot(e_last, u_all, preferred_element_type=f32)             # (2, 64)
    x_last = jnp.dot(e_last, x_emb, preferred_element_type=f32)             # (2, 32)

    gated = u_last * o_un * pl.reciprocal(d_uv, approx=False)               # GAU gate
    attn_out = jnp.dot(gated, w_o, preferred_element_type=f32) + bo         # (2, 32)

    # --- EncoderLayer residual + LN, Encoder final LN, last-step projection ---
    x1 = _layernorm(x_last + attn_out, g1, b1)
    x2 = _layernorm(x1, gn, bn)
    out_ref[...] = jnp.dot(x2, w_p, preferred_element_type=f32) + bp        # (B, OUT)


# ---------------- one-time weight/constant packing (host side, cached) ----------------
def pack_weights(p):
    scale = 1.0 / math.sqrt(QK)
    npf = lambda a: np.asarray(a, np.float32)
    cat = lambda w: np.concatenate(list(npf(w)), axis=-1)        # (H, a, b) -> (a, H*b)

    w_uv = np.concatenate([cat(p["wu"]), cat(p["wv"])], axis=1)              # (32, 128)
    b_uv = np.concatenate([cat(p["bu"]), cat(p["bv"])], axis=1)              # (1, 128)
    w_z, b_z = cat(p["wz"]), cat(p["bz"])                                    # (32,32),(1,32)
    w_o = np.concatenate(list(npf(p["wo"])), axis=0)                         # (64, 32)
    gq, bq = cat(p["gq"]) * scale, cat(p["bq"]) * scale                      # fold 1/sqrt(QK)
    gk, bk = cat(p["gk"]), cat(p["bk"])
    wtok = npf(p["wtok"])
    wtok_cat = np.concatenate([wtok[0:ENC_IN], wtok[ENC_IN:2 * ENC_IN],
                               wtok[2 * ENC_IN:3 * ENC_IN]], axis=1)         # (4, 96)
    pe_tiled = np.tile(npf(p["pe"]), (B, 1))                                 # (32, 32)

    # constant 0/1 structure matrices
    r = np.arange(B * S)
    bi, si = r // S, r % S
    oh = lambda c, n: (np.asarray(c)[:, None] == np.arange(n)[None, :]).astype(np.float32)
    p_prev = oh(bi * S + (si - 1) % S, B * S)                    # row r selects prev row
    p_next = oh(bi * S + (si + 1) % S, B * S)                    # row r selects next row
    sel_bc = oh(bi * S + (S - 1), B * S)                         # row r selects last row of b
    e_sum = (np.arange(B)[:, None] == bi[None, :]).astype(np.float32)        # (B, B*S)
    e_last = oh(np.arange(B) * S + (S - 1), B * S)                           # (B, B*S)
    seg_qk = (np.arange(HQK)[:, None] // QK
              == np.arange(N_HEADS)[None, :]).astype(np.float32)             # (32, 4)
    seg_uv = (np.arange(N_HEADS)[:, None]
              == np.arange(HUV)[None, :] // UV).astype(np.float32)           # (4, 64)

    vec_qk = np.concatenate([gq, bq, gk, bk], axis=1)                        # (1, 128)
    vec_ln = np.concatenate([npf(p["g1"]), npf(p["b1"]),
                             npf(p["gn"]), npf(p["bn"])], axis=1)            # (1, 128)
    vec_b = np.concatenate([b_z, npf(p["bo"]), npf(p["bp"])], axis=1)        # (1, 68)

    blocks = [
        (R_WTOK, wtok_cat), (R_WUV, w_uv), (R_WZ, w_z), (R_WO, w_o), (R_WP, npf(p["wp"])),
        (R_PE, pe_tiled), (R_PPREV, p_prev), (R_PNEXT, p_next), (R_SELB, sel_bc),
        (R_SEGQK, seg_qk), (R_SEGUV, seg_uv), (R_ESUM, e_sum), (R_ELAST, e_last),
        (R_VEC + 0, vec_qk), (R_VEC + 1, vec_ln), (R_VEC + 2, b_uv), (R_VEC + 3, vec_b),
    ]
    slab = np.zeros((SLAB_ROWS, SLAB_W), np.float32)
    for row, blk in blocks:
        slab[row:row + blk.shape[0], 0:blk.shape[1]] = blk
    return jnp.asarray(slab)


# ---------------- hot-path wrapper: reshape + exactly one pallas_call ----------------
@jax.jit
def multi_head_gau_forward(x_enc, slab):
    x_flat = x_enc.reshape(B * S, ENC_IN)            # fold batch into sublanes (free under jit)
    out = pl.pallas_call(
        gau_forward_kernel,
        out_shape=jax.ShapeDtypeStruct((B, OUT_SIZE), jnp.float32),
    )(x_flat, slab)
    return out.reshape(B, 1, OUT_SIZE)               # match nn.Module output shape


# ---------------- deterministic parameter init (per-head, unfused) ----------------
def init_params(key):
    ks = jax.random.split(key, 10)

    def n(k, shape, scale=0.1):
        return jax.random.normal(k, shape, jnp.float32) * scale

    # sinusoidal positional encoding
    pos = jnp.arange(S, dtype=jnp.float32)[:, None]
    i = jnp.arange(0, D_MODEL, 2, dtype=jnp.float32)
    div = jnp.exp(-i * (math.log(10000.0) / D_MODEL))
    pe = jnp.zeros((S, D_MODEL), jnp.float32)
    pe = pe.at[:, 0::2].set(jnp.sin(pos * div))
    pe = pe.at[:, 1::2].set(jnp.cos(pos * div))

    return dict(
        pe=pe,
        wtok=n(ks[0], (3 * ENC_IN, D_MODEL)),                 # TokenEmbedding circular conv
        wu=n(ks[1], (N_HEADS, D_MODEL, UV)),
        bu=jnp.zeros((N_HEADS, 1, UV), jnp.float32),
        wv=n(ks[2], (N_HEADS, D_MODEL, UV)),
        bv=jnp.zeros((N_HEADS, 1, UV), jnp.float32),
        wz=n(ks[3], (N_HEADS, D_MODEL, QK)),
        bz=jnp.zeros((N_HEADS, 1, QK), jnp.float32),
        gq=1.0 + n(ks[4], (N_HEADS, 1, QK)),                  # per-head affine (use_aff)
        bq=n(ks[5], (N_HEADS, 1, QK)),
        gk=1.0 + n(ks[6], (N_HEADS, 1, QK)),
        bk=n(ks[7], (N_HEADS, 1, QK)),
        wo=n(ks[8], (N_HEADS, UV, D_MODEL)),                  # output projection
        bo=jnp.zeros((1, D_MODEL), jnp.float32),
        g1=jnp.ones((1, D_MODEL), jnp.float32),               # EncoderLayer norm
        b1=jnp.zeros((1, D_MODEL), jnp.float32),
        gn=jnp.ones((1, D_MODEL), jnp.float32),               # Encoder final norm
        bn=jnp.zeros((1, D_MODEL), jnp.float32),
        wp=n(ks[9], (D_MODEL, OUT_SIZE)),                     # self.projection
        bp=jnp.zeros((1, OUT_SIZE), jnp.float32),
    )


# ---------------- pure-JAX reference (per-head, unfused — validates all fusions) ------
def reference_forward(x_enc, p):
    x_pad = jnp.concatenate([x_enc[:, -1:, :], x_enc, x_enc[:, :1, :]], axis=1)
    patches = jnp.concatenate([x_pad[:, k:k + S, :] for k in range(3)], axis=-1)
    outs = []
    for b in range(B):
        x = patches[b] @ p["wtok"] + p["pe"]
        acc = jnp.zeros((S, D_MODEL), jnp.float32)
        for h in range(N_HEADS):
            u = _silu(x @ p["wu"][h] + p["bu"][h])
            v = _silu(x @ p["wv"][h] + p["bv"][h])
            z = _silu(x @ p["wz"][h] + p["bz"][h])
            q = z * p["gq"][h] + p["bq"][h]
            k_ = z * p["gk"][h] + p["bk"][h]
            s = (q @ k_.T) / math.sqrt(QK)
            attn = jax.nn.softmax(s, axis=-1)
            acc = acc + (u * (attn @ v)) @ p["wo"][h]
        x1 = _layernorm(x + acc + p["bo"], p["g1"], p["b1"])
        x2 = _layernorm(x1, p["gn"], p["bn"])
        outs.append(x2[S - 1:S, :] @ p["wp"] + p["bp"])
    return jnp.stack(outs, axis=0)                             # (B, 1, OUT)


if __name__ == "__main__":
    key = jax.random.PRNGKey(0)
    kx, kp = jax.random.split(key)
    x_enc = jax.random.normal(kx, (B, S, ENC_IN), jnp.float32)
    params = init_params(kp)

    slab = pack_weights(params)          # built ONCE per parameter set (hot path untouched)
    out = multi_head_gau_forward(x_enc, slab)
    out = jax.block_until_ready(out)

    ref = reference_forward(x_enc, params)
    assert out.shape == (B, 1, OUT_SIZE), out.shape
    # tolerance covers default (bf16-pass) MXU precision differences between groupings
    assert jnp.allclose(out, ref, atol=5e-3, rtol=5e-3), (out, ref)
    print("KERNEL_OK")
</pallas_src>

<mosaic_0001>
module attributes {stable_mosaic.version = 11 : i64} {
  func.func @gau_forward_kernel(%arg0: memref<32x4xf32, #tpu.memory_space<vmem>>, %arg1: memref<352x128xf32, #tpu.memory_space<vmem>>, %arg2: memref<2x4xf32, #tpu.memory_space<vmem>>) attributes {dimension_semantics = [], scalar_prefetch = 0 : i64, scratch_operands = 0 : i64, tpu.core_type = #tpu.core_type<tc>} {
    %c0 = arith.constant 0 : index
    %c0_0 = arith.constant 0 : index
    %0 = vector.load %arg1[%c0, %c0_0] : memref<352x128xf32, #tpu.memory_space<vmem>>, vector<4x96xf32>
    %c8 = arith.constant 8 : index
    %c0_1 = arith.constant 0 : index
    %1 = vector.load %arg1[%c8, %c0_1] : memref<352x128xf32, #tpu.memory_space<vmem>>, vector<32x128xf32>
    %c40 = arith.constant 40 : index
    %c0_2 = arith.constant 0 : index
    %2 = vector.load %arg1[%c40, %c0_2] : memref<352x128xf32, #tpu.memory_space<vmem>>, vector<32x32xf32>
    %c72 = arith.constant 72 : index
    %c0_3 = arith.constant 0 : index
    %3 = vector.load %arg1[%c72, %c0_3] : memref<352x128xf32, #tpu.memory_space<vmem>>, vector<64x32xf32>
    %c136 = arith.constant 136 : index
    %c0_4 = arith.constant 0 : index
    %4 = vector.load %arg1[%c136, %c0_4] : memref<352x128xf32, #tpu.memory_space<vmem>>, vector<32x4xf32>
    %c168 = arith.constant 168 : index
    %c0_5 = arith.constant 0 : index
    %5 = vector.load %arg1[%c168, %c0_5] : memref<352x128xf32, #tpu.memory_space<vmem>>, vector<32x32xf32>
    %c200 = arith.constant 200 : index
    %c0_6 = arith.constant 0 : index
    %6 = vector.load %arg1[%c200, %c0_6] : memref<352x128xf32, #tpu.memory_space<vmem>>, vector<32x32xf32>
    %c232 = arith.constant 232 : index
    %c0_7 = arith.constant 0 : index
    %7 = vector.load %arg1[%c232, %c0_7] : memref<352x128xf32, #tpu.memory_space<vmem>>, vector<32x32xf32>
    %c264 = arith.constant 264 : index
    %c0_8 = arith.constant 0 : index
    %8 = vector.load %arg1[%c264, %c0_8] : memref<352x128xf32, #tpu.memory_space<vmem>>, vector<32x32xf32>
    %c296 = arith.constant 296 : index
    %c0_9 = arith.constant 0 : index
    %9 = vector.load %arg1[%c296, %c0_9] : memref<352x128xf32, #tpu.memory_space<vmem>>, vector<32x4xf32>
    %c328 = arith.constant 328 : index
    %c0_10 = arith.constant 0 : index
    %10 = vector.load %arg1[%c328, %c0_10] : memref<352x128xf32, #tpu.memory_space<vmem>>, vector<4x64xf32>
    %c336 = arith.constant 336 : index
    %c0_11 = arith.constant 0 : index
    %11 = vector.load %arg1[%c336, %c0_11] : memref<352x128xf32, #tpu.memory_space<vmem>>, vector<2x32xf32>
    %c338 = arith.constant 338 : index
    %c0_12 = arith.constant 0 : index
    %12 = vector.load %arg1[%c338, %c0_12] : memref<352x128xf32, #tpu.memory_space<vmem>>, vector<2x32xf32>
    %c344 = arith.constant 344 : index
    %c0_13 = arith.constant 0 : index
    %13 = vector.load %arg1[%c344, %c0_13] : memref<352x128xf32, #tpu.memory_space<vmem>>, vector<1x128xf32>
    %14 = vector.extract_strided_slice %13 {offsets = [0, 0], sizes = [1, 32], strides = [1, 1]} : vector<1x128xf32> to vector<1x32xf32>
    %15 = vector.extract_strided_slice %13 {offsets = [0, 32], sizes = [1, 32], strides = [1, 1]} : vector<1x128xf32> to vector<1x32xf32>
    %16 = vector.extract_strided_slice %13 {offsets = [0, 64], sizes = [1, 32], strides = [1, 1]} : vector<1x128xf32> to vector<1x32xf32>
    %17 = vector.extract_strided_slice %13 {offsets = [0, 96], sizes = [1, 32], strides = [1, 1]} : vector<1x128xf32> to vector<1x32xf32>
    %c345 = arith.constant 345 : index
    %c0_14 = arith.constant 0 : index
    %18 = vector.load %arg1[%c345, %c0_14] : memref<352x128xf32, #tpu.memory_space<vmem>>, vector<1x128xf32>
    %19 = vector.extract_strided_slice %18 {offsets = [0, 0], sizes = [1, 32], strides = [1, 1]} : vector<1x128xf32> to vector<1x32xf32>
    %20 = vector.extract_strided_slice %18 {offsets = [0, 32], sizes = [1, 32], strides = [1, 1]} : vector<1x128xf32> to vector<1x32xf32>
    %21 = vector.extract_strided_slice %18 {offsets = [0, 64], sizes = [1, 32], strides = [1, 1]} : vector<1x128xf32> to vector<1x32xf32>
    %22 = vector.extract_strided_slice %18 {offsets = [0, 96], sizes = [1, 32], strides = [1, 1]} : vector<1x128xf32> to vector<1x32xf32>
    %c346 = arith.constant 346 : index
    %c0_15 = arith.constant 0 : index
    %23 = vector.load %arg1[%c346, %c0_15] : memref<352x128xf32, #tpu.memory_space<vmem>>, vector<1x128xf32>
    %c347 = arith.constant 347 : index
    %c0_16 = arith.constant 0 : index
    %24 = vector.load %arg1[%c347, %c0_16] : memref<352x128xf32, #tpu.memory_space<vmem>>, vector<1x128xf32>
    %25 = vector.extract_strided_slice %24 {offsets = [0, 0], sizes = [1, 32], strides = [1, 1]} : vector<1x128xf32> to vector<1x32xf32>
    %26 = vector.extract_strided_slice %24 {offsets = [0, 32], sizes = [1, 32], strides = [1, 1]} : vector<1x128xf32> to vector<1x32xf32>
    %27 = vector.extract_strided_slice %24 {offsets = [0, 64], sizes = [1, 4], strides = [1, 1]} : vector<1x128xf32> to vector<1x4xf32>
    %c0_17 = arith.constant 0 : index
    %c0_18 = arith.constant 0 : index
    %28 = vector.load %arg0[%c0_17, %c0_18] : memref<32x4xf32, #tpu.memory_space<vmem>>, vector<32x4xf32>
    %cst = arith.constant dense<0.000000e+00> : vector<32x96xf32>
    %29 = tpu.matmul %28, %0, %cst {dimension_numbers = #tpu.dot_dimension_numbers<[1], [0], [0], [1], [0, 0, 1, 1], [], []>} : vector<32x4xf32>, vector<4x96xf32>, vector<32x96xf32> -> vector<32x96xf32>
    %30 = vector.extract_strided_slice %29 {offsets = [0, 0], sizes = [32, 32], strides = [1, 1]} : vector<32x96xf32> to vector<32x32xf32>
    %cst_19 = arith.constant dense<0.000000e+00> : vector<32x32xf32>
    %31 = tpu.matmul %6, %30, %cst_19 {dimension_numbers = #tpu.dot_dimension_numbers<[1], [0], [0], [1], [0, 0, 1, 1], [], []>} : vector<32x32xf32>, vector<32x32xf32>, vector<32x32xf32> -> vector<32x32xf32>
    %32 = vector.extract_strided_slice %29 {offsets = [0, 32], sizes = [32, 32], strides = [1, 1]} : vector<32x96xf32> to vector<32x32xf32>
    %33 = arith.addf %31, %32 : vector<32x32xf32>
    %34 = vector.extract_strided_slice %29 {offsets = [0, 64], sizes = [32, 32], strides = [1, 1]} : vector<32x96xf32> to vector<32x32xf32>
    %cst_20 = arith.constant dense<0.000000e+00> : vector<32x32xf32>
    %35 = tpu.matmul %7, %34, %cst_20 {dimension_numbers = #tpu.dot_dimension_numbers<[1], [0], [0], [1], [0, 0, 1, 1], [], []>} : vector<32x32xf32>, vector<32x32xf32>, vector<32x32xf32> -> vector<32x32xf32>
    %36 = arith.addf %33, %35 : vector<32x32xf32>
    %37 = arith.addf %36, %5 : vector<32x32xf32>
    %cst_21 = arith.constant dense<0.000000e+00> : vector<32x128xf32>
    %38 = tpu.matmul %37, %1, %cst_21 {dimension_numbers = #tpu.dot_dimension_numbers<[1], [0], [0], [1], [0, 0, 1, 1], [], []>} : vector<32x32xf32>, vector<32x128xf32>, vector<32x128xf32> -> vector<32x128xf32>
    %39 = vector.broadcast %23 : vector<1x128xf32> to vector<32x128xf32>
    %40 = arith.addf %38, %39 : vector<32x128xf32>
    %41 = arith.negf %40 : vector<32x128xf32>
    %42 = math.exp %41 : vector<32x128xf32>
    %cst_22 = arith.constant 1.000000e+00 : f32
    %43 = vector.broadcast %cst_22 : f32 to vector<32x128xf32>
    %44 = arith.addf %43, %42 : vector<32x128xf32>
    %45 = arith.divf %43, %44 : vector<32x128xf32>
    %46 = arith.mulf %40, %45 : vector<32x128xf32>
    %47 = vector.extract_strided_slice %46 {offsets = [0, 0], sizes = [32, 64], strides = [1, 1]} : vector<32x128xf32> to vector<32x64xf32>
    %48 = vector.extract_strided_slice %46 {offsets = [0, 64], sizes = [32, 64], strides = [1, 1]} : vector<32x128xf32> to vector<32x64xf32>
    %cst_23 = arith.constant dense<0.000000e+00> : vector<32x32xf32>
    %49 = tpu.matmul %37, %2, %cst_23 {dimension_numbers = #tpu.dot_dimension_numbers<[1], [0], [0], [1], [0, 0, 1, 1], [], []>} : vector<32x32xf32>, vector<32x32xf32>, vector<32x32xf32> -> vector<32x32xf32>
    %50 = vector.broadcast %25 : vector<1x32xf32> to vector<32x32xf32>
    %51 = arith.addf %49, %50 : vector<32x32xf32>
    %52 = arith.negf %51 : vector<32x32xf32>
    %53 = math.exp %52 : vector<32x32xf32>
    %cst_24 = arith.constant 1.000000e+00 : f32
    %54 = vector.broadcast %cst_24 : f32 to vector<32x32xf32>
    %55 = arith.addf %54, %53 : vector<32x32xf32>
    %56 = arith.divf %54, %55 : vector<32x32xf32>
    %57 = arith.mulf %51, %56 : vector<32x32xf32>
    %58 = vector.broadcast %14 : vector<1x32xf32> to vector<32x32xf32>
    %59 = arith.mulf %57, %58 : vector<32x32xf32>
    %60 = vector.broadcast %15 : vector<1x32xf32> to vector<32x32xf32>
    %61 = arith.addf %59, %60 : vector<32x32xf32>
    %62 = vector.broadcast %16 : vector<1x32xf32> to vector<32x32xf32>
    %63 = arith.mulf %57, %62 : vector<32x32xf32>
    %64 = vector.broadcast %17 : vector<1x32xf32> to vector<32x32xf32>
    %65 = arith.addf %63, %64 : vector<32x32xf32>
    %cst_25 = arith.constant dense<0.000000e+00> : vector<32x32xf32>
    %66 = tpu.matmul %8, %61, %cst_25 {dimension_numbers = #tpu.dot_dimension_numbers<[1], [0], [0], [1], [0, 0, 1, 1], [], []>} : vector<32x32xf32>, vector<32x32xf32>, vector<32x32xf32> -> vector<32x32xf32>
    %67 = arith.mulf %65, %66 : vector<32x32xf32>
    %cst_26 = arith.constant dense<0.000000e+00> : vector<32x4xf32>
    %68 = tpu.matmul %67, %9, %cst_26 {dimension_numbers = #tpu.dot_dimension_numbers<[1], [0], [0], [1], [0, 0, 1, 1], [], []>} : vector<32x32xf32>, vector<32x4xf32>, vector<32x4xf32> -> vector<32x4xf32>
    %cst_27 = arith.constant dense<0xFF800000> : vector<4xf32>
    %69 = vector.multi_reduction <maximumf>, %68, %cst_27 [0] : vector<32x4xf32> to vector<4xf32>
    %70 = vector.shape_cast %69 : vector<4xf32> to vector<1x4xf32>
    %71 = vector.broadcast %70 : vector<1x4xf32> to vector<32x4xf32>
    %72 = arith.subf %68, %71 : vector<32x4xf32>
    %73 = math.exp %72 : vector<32x4xf32>
    %cst_28 = arith.constant dense<0.000000e+00> : vector<32x64xf32>
    %74 = tpu.matmul %73, %10, %cst_28 {dimension_numbers = #tpu.dot_dimension_numbers<[1], [0], [0], [1], [0, 0, 1, 1], [], []>} : vector<32x4xf32>, vector<4x64xf32>, vector<32x64xf32> -> vector<32x64xf32>
    %75 = arith.mulf %74, %48 : vector<32x64xf32>
    %cst_29 = arith.constant dense<0.000000e+00> : vector<2x64xf32>
    %76 = tpu.matmul %11, %75, %cst_29 {dimension_numbers = #tpu.dot_dimension_numbers<[1], [0], [0], [1], [0, 0, 1, 1], [], []>} : vector<2x32xf32>, vector<32x64xf32>, vector<2x64xf32> -> vector<2x64xf32>
    %cst_30 = arith.constant dense<0.000000e+00> : vector<2x64xf32>
    %77 = tpu.matmul %11, %74, %cst_30 {dimension_numbers = #tpu.dot_dimension_numbers<[1], [0], [0], [1], [0, 0, 1, 1], [], []>} : vector<2x32xf32>, vector<32x64xf32>, vector<2x64xf32> -> vector<2x64xf32>
    %cst_31 = arith.constant dense<0.000000e+00> : vector<2x64xf32>
    %78 = tpu.matmul %12, %47, %cst_31 {dimension_numbers = #tpu.dot_dimension_numbers<[1], [0], [0], [1], [0, 0, 1, 1], [], []>} : vector<2x32xf32>, vector<32x64xf32>, vector<2x64xf32> -> vector<2x64xf32>
    %cst_32 = arith.constant dense<0.000000e+00> : vector<2x32xf32>
    %79 = tpu.matmul %12, %37, %cst_32 {dimension_numbers = #tpu.dot_dimension_numbers<[1], [0], [0], [1], [0, 0, 1, 1], [], []>} : vector<2x32xf32>, vector<32x32xf32>, vector<2x32xf32> -> vector<2x32xf32>
    %80 = arith.mulf %78, %76 : vector<2x64xf32>
    %81 = tpu.reciprocal %77 : vector<2x64xf32> -> vector<2x64xf32>
    %82 = arith.mulf %80, %81 : vector<2x64xf32>
    %cst_33 = arith.constant dense<0.000000e+00> : vector<2x32xf32>
    %83 = tpu.matmul %82, %3, %cst_33 {dimension_numbers = #tpu.dot_dimension_numbers<[1], [0], [0], [1], [0, 0, 1, 1], [], []>} : vector<2x64xf32>, vector<64x32xf32>, vector<2x32xf32> -> vector<2x32xf32>
    %84 = vector.broadcast %26 : vector<1x32xf32> to vector<2x32xf32>
    %85 = arith.addf %83, %84 : vector<2x32xf32>
    %86 = arith.addf %79, %85 : vector<2x32xf32>
    %cst_34 = arith.constant dense<0.000000e+00> : vector<2xf32>
    %87 = vector.multi_reduction <add>, %86, %cst_34 [1] : vector<2x32xf32> to vector<2xf32>
    %88 = vector.shape_cast %87 : vector<2xf32> to vector<2x1xf32>
    %cst_35 = arith.constant 3.200000e+01 : f32
    %89 = vector.broadcast %cst_35 : f32 to vector<2x1xf32>
    %90 = arith.divf %88, %89 : vector<2x1xf32>
    %91 = vector.broadcast %90 : vector<2x1xf32> to vector<2x32xf32>
    %92 = arith.subf %86, %91 : vector<2x32xf32>
    %93 = arith.mulf %92, %92 : vector<2x32xf32>
    %cst_36 = arith.constant dense<0.000000e+00> : vector<2xf32>
    %94 = vector.multi_reduction <add>, %93, %cst_36 [1] : vector<2x32xf32> to vector<2xf32>
    %95 = vector.shape_cast %94 : vector<2xf32> to vector<2x1xf32>
    %cst_37 = arith.constant 3.200000e+01 : f32
    %96 = vector.broadcast %cst_37 : f32 to vector<2x1xf32>
    %97 = arith.divf %95, %96 : vector<2x1xf32>
    %98 = vector.broadcast %90 : vector<2x1xf32> to vector<2x32xf32>
    %99 = arith.subf %86, %98 : vector<2x32xf32>
    %cst_38 = arith.constant 9.99999974E-6 : f32
    %100 = vector.broadcast %cst_38 : f32 to vector<2x1xf32>
    %101 = arith.addf %97, %100 : vector<2x1xf32>
    %102 = math.rsqrt %101 : vector<2x1xf32>
    %103 = vector.broadcast %102 : vector<2x1xf32> to vector<2x32xf32>
    %104 = arith.mulf %99, %103 : vector<2x32xf32>
    %105 = vector.broadcast %19 : vector<1x32xf32> to vector<2x32xf32>
    %106 = arith.mulf %104, %105 : vector<2x32xf32>
    %107 = vector.broadcast %20 : vector<1x32xf32> to vector<2x32xf32>
    %108 = arith.addf %106, %107 : vector<2x32xf32>
    %cst_39 = arith.constant dense<0.000000e+00> : vector<2xf32>
    %109 = vector.multi_reduction <add>, %108, %cst_39 [1] : vector<2x32xf32> to vector<2xf32>
    %110 = vector.shape_cast %109 : vector<2xf32> to vector<2x1xf32>
    %cst_40 = arith.constant 3.200000e+01 : f32
    %111 = vector.broadcast %cst_40 : f32 to vector<2x1xf32>
    %112 = arith.divf %110, %111 : vector<2x1xf32>
    %113 = vector.broadcast %112 : vector<2x1xf32> to vector<2x32xf32>
    %114 = arith.subf %108, %113 : vector<2x32xf32>
    %115 = arith.mulf %114, %114 : vector<2x32xf32>
    %cst_41 = arith.constant dense<0.000000e+00> : vector<2xf32>
    %116 = vector.multi_reduction <add>, %115, %cst_41 [1] : vector<2x32xf32> to vector<2xf32>
    %117 = vector.shape_cast %116 : vector<2xf32> to vector<2x1xf32>
    %cst_42 = arith.constant 3.200000e+01 : f32
    %118 = vector.broadcast %cst_42 : f32 to vector<2x1xf32>
    %119 = arith.divf %117, %118 : vector<2x1xf32>
    %120 = vector.broadcast %112 : vector<2x1xf32> to vector<2x32xf32>
    %121 = arith.subf %108, %120 : vector<2x32xf32>
    %cst_43 = arith.constant 9.99999974E-6 : f32
    %122 = vector.broadcast %cst_43 : f32 to vector<2x1xf32>
    %123 = arith.addf %119, %122 : vector<2x1xf32>
    %124 = math.rsqrt %123 : vector<2x1xf32>
    %125 = vector.broadcast %124 : vector<2x1xf32> to vector<2x32xf32>
    %126 = arith.mulf %121, %125 : vector<2x32xf32>
    %127 = vector.broadcast %21 : vector<1x32xf32> to vector<2x32xf32>
    %128 = arith.mulf %126, %127 : vector<2x32xf32>
    %129 = vector.broadcast %22 : vector<1x32xf32> to vector<2x32xf32>
    %130 = arith.addf %128, %129 : vector<2x32xf32>
    %cst_44 = arith.constant dense<0.000000e+00> : vector<2x4xf32>
    %131 = tpu.matmul %130, %4, %cst_44 {dimension_numbers = #tpu.dot_dimension_numbers<[1], [0], [0], [1], [0, 0, 1, 1], [], []>} : vector<2x32xf32>, vector<32x4xf32>, vector<2x4xf32> -> vector<2x4xf32>
    %132 = vector.broadcast %27 : vector<1x4xf32> to vector<2x4xf32>
    %133 = arith.addf %131, %132 : vector<2x4xf32>
    %c0_45 = arith.constant 0 : index
    %c0_46 = arith.constant 0 : index
    %134 = vector.load %arg2[%c0_45, %c0_46] : memref<2x4xf32, #tpu.memory_space<vmem>>, vector<2x4xf32>
    tpu.vector_store %arg2[%c0_45, %c0_46], %133 {strides = array<i32>} : memref<2x4xf32, #tpu.memory_space<vmem>>, vector<2x4xf32>,
    return
  }
}

</mosaic_0001>

<bundles_post_ra>
// kernel: multi_head_gau_forward.1
= control target key start
LH: loop header
LB: loop body
LE: loop exit
PB: predicated region body
PF: predicated region fallthrough
CT: control target
= control target key end

     0   :  { %7 = vsyncpa [#allocation3], 0  ;;  %s2288_s0 = inlined_call_operand.vmem [shape: f32[32,4], index: 0, kind: input, shape index: {}]   ;;  %s2289_s1 = inlined_call_operand.hbm [shape: f32[352,128], index: 1, kind: input, shape index: {}]   ;;  %s2290_s2 = inlined_call_operand.hbm [shape: f32[2,4], index: 2, kind: output, shape index: {}]  }
   0x1   :  { %8 = vsyncpa [#allocation4], 0  ;;  %s2069_s9 = smov [#allocation2]   ;;  %s2021_s13 = scalar_lea.hbm %s2289_s1, 5632 }
   0x2   :  { %s16_s10 = sshll.u32 %s2069_s9, 4  ;;  %p2022_p0 = scmp.ne.s32.totalorder %s2289_s1, %s2021_s13  ;;  %s17_s10 = int_to_ptr.vmem [resolvable:$true] %s16_s10 }
   0x3   :  { %p2025_p1 = scmp.lt.u32.totalorder %s2021_s13, %s2289_s1 }
   0x5   :  { %p2027_p2 = pnand %p2025_p1, %p2022_p0 }
   0x7   :  { %2030 = shalt.err (!%p2027_p2)
}
   0x8   :  { %s2031_s18 = scalar_lea.vmem %s17_s10, 5632  ;;  %p2036_p4 = scmp.lt.s32.totalorder %s17_s10, %s17_s10 }
   0x9   :  { %p2032_p3 = scmp.ne.s32.totalorder %s17_s10, %s2031_s18  ;;  %p2037_p5 = scmp.lt.s32.totalorder %s2031_s18, %s2031_s18 }
   0xb   :  { %p2038_p6 = por %p2037_p5, %p2036_p4 }
   0xd   :  { %p2039_p7 = pnand %p2038_p6, %p2032_p3 }
   0xf   :  { %2042 = shalt.err (!%p2039_p7)
}
  0x10   :  { %s2070_s19 = smov 128   ;;  %s2071_s20 = smov 8  }
  0x11   :  { %22 = dma.hbm_to_vmem [thread:$0]  %s2289_s1, 5632, %s17_s10, [#allocation3], %s2070_s19, %s2070_s19, %s2071_s20  }
  0x12   :  { %2065 = dma.done.wait [#allocation3], 5632  }
  0x13   :  { %2066 = vsyncadd [#allocation3], 4294961664  ;;  %vm91_vm0 = vcmask 1043456   ;;  %vm78_vm1 = vcmask 31744   ;;  %v26_v0 = vld [vmem:[#allocation2] sm:$0xf] }
  0x14   :  { %v74_v1 = vld [vmem:[%s2288_s0] sm:$0xff]  ;;  %v75_v2 = vld [vmem:[%s2288_s0 + $0x8] sm:$0xff]  ;;  %1680 = vmatprep.subr.msk.mxu0 %vm91_vm0, %v26_v0  ;;  %v76_v3 = vld [vmem:[%s2288_s0 + $0x10] sm:$0xff]  ;;  %vm196_vm2 = vcmask 261120   ;;  %s2072_s30 = smov 96   ;;  %s2073_s3 = smov 64  }
  0x15   :  { %1682 = vmatprep.mubr.msk.f32.mxu0 %vm78_vm1, %v74_v1  ;;  %1681 = vmatpush3.msk.msra.mxu0 %vm91_vm0, %v26_v0  ;;  %v77_v4 = vld [vmem:[%s2288_s0 + $0x18] sm:$0xff]  ;;  %v51_v5 = vld [vmem:[#allocation2 + $0xc8] sm:$0xff]  ;;  %v52_v15 = vld [vmem:[#allocation2 + $0xd0] sm:$0xff]  ;;  %s2074_s0 = smov 32   ;;  %vm2076_vm3 = vmmov 0   ;;  %vm1253_vm4 = vcmask 523264  }
  0x16   :  { %1683 = vmatmul.mubr.msk.f32.vlgmr.msra.gmra.mrb[0].mxu0 %vm78_vm1, %v75_v2  ;;  %v55_v7 = vld [vmem:[#allocation2 + $0xe8] sm:$0xff]  ;;  %v53_v16 = vld [vmem:[#allocation2 + $0xd8] sm:$0xff]  ;;  %v54_v17 = vld [vmem:[#allocation2 + $0xe0] sm:$0xff]  ;;  %vm1397_vm5 = vcmask 254976   ;;  %s2078_s4 = smov [#allocation5]   ;;  %vm1519_vm6 = vcmask 25600  }
  0x17   :  { %1685 = vmatprep.mubr.msk.f32.mxu0 %vm78_vm1, %v76_v3  ;;  %1710 = vmatprep.mubr.msk.f32.mxu1 %vm196_vm2, %v55_v7  ;;  %v27_v18 = vld [vmem:[#allocation2 + $0x8] sm:$0xff]  ;;  %v28_v19 = vld [vmem:[#allocation2 + $0x10] sm:$0xff]  ;;  %v57_v30 = vld [vmem:[#allocation2 + $0xf8] sm:$0xff]  ;;  %s1527_s5 = sshll.u32 %s2078_s4, 4  ;;  %s1528_s5 = int_to_ptr.vmem [resolvable:$true] %s1527_s5 }
  0x18   :  { %v1870_v20 = vpack.c.bf16 %v28_v19, %v27_v18  ;;  %v56_v29 = vld [vmem:[#allocation2 + $0xf0] sm:$0xff]  ;;  %v58_v31 = vld [vmem:[#allocation2 + $0x100] sm:$0xff]  ;;  %v29_v32 = vld [vmem:[#allocation2 + $0x18] sm:$0xff]  ;;  %s2043_s6 = scalar_lea.vmem %s1528_s5, 32  ;;  %p2048_p9 = scmp.lt.s32.totalorder %s1528_s5, %s1528_s5 }
  0x19   :  { %v30_v33 = vld [vmem:[#allocation2 + $0x20] sm:$0xff]  ;;  %v31_v35 = vld [vmem:[#allocation2 + $0x28] sm:$0xff]  ;;  %v32_v36 = vld [vmem:[#allocation2 + $0x30] sm:$0xff]  ;;  %p2044_p8 = scmp.ne.s32.totalorder %s1528_s5, %s2043_s6  ;;  %p2049_p10 = scmp.lt.s32.totalorder %s2043_s6, %s2043_s6 }
  0x1a   :  { %1686 = vmatmul.mubr.msk.f32.gmra.mrb[2].mxu0 %vm78_vm1, %v77_v4  ;;  %v1874_v34 = vpack.c.bf16 %v30_v33, %v29_v32  ;;  %v1878_v37 = vpack.c.bf16 %v32_v36, %v31_v35  ;;  %v2138_v42 = vld [vmem:[#allocation2 + $0x158] ss:$0 sm:$0xff]  ;;  %v48_v47 = vld [vmem:[#allocation2 + $0xb0] sm:$0xff]  ;;  %v47_v50 = vld [vmem:[#allocation2 + $0xa8] sm:$0xff] }
  0x1b   :  { %1696 = vmatprep.mubr.msk.f32.mxu0 %vm196_vm2, %v51_v5  ;;  %v33_v54 = vld [vmem:[#allocation2 + $0x38] sm:$0xff]  ;;  %v34_v55 = vld [vmem:[#allocation2 + $0x40] sm:$0xff]  ;;  %p2050_p11 = por %p2049_p10, %p2048_p9 }
  0x1c   :  { %v50_v61 = vld [vmem:[#allocation2 + $0xc0] sm:$0xff]  ;;  %v49_v0 = vld [vmem:[#allocation2 + $0xb8] sm:$0xff]  ;;  %v1882_v2 = vpack.c.bf16 %v34_v55, %v33_v54 }
  0x1d   :  { %p2051_p12 = pnand %p2050_p11, %p2044_p8 }
  0xe9   :  { %v1684_v6 = vpop.f32.mrb[0].mxu0 }
  0xea   :  { %v161_v8 = vpop.f32.mrb[1].mxu0 }
  0xeb   :  { %v1854_v9 = vpack.c.bf16 %v1684_v6, %v161_v8  ;;  %184 = vrot.lane.b32.xlu1 %v161_v8, %s2072_s30  ;;  %v1965_v10 = vpack.i.bf16 %v1684_v6, %v161_v8  ;;  %v59_v8 = vld [vmem:[#allocation2 + $0x108] sm:$0xff] }
  0xed   :  { %1966 = vrot.lane.b32.xlu0 %v1965_v10, %s2073_s3  ;;  %v1687_v11 = vpop.f32.mrb[2].mxu0  ;;  %1855 = vmatprep.subr.bf16.mxu0 %v1854_v9 }
  0xee   :  { %v171_v12 = vpop.f32.mrb[3].mxu0  ;;  %1857 = vmatpush3.bf16.msra.mxu0 %v1854_v9  ;;  %v1549_v9 = vld [vmem:[#allocation2 + $0x15a] ss:$0 sm:$0xff] }
  0xef   :  { %v1970_v13 = vpack.i.bf16 %v1687_v11, %v171_v12  ;;  %v1858_v14 = vpack.c.bf16 %v1687_v11, %v171_v12  ;;  %186 = vrot.lane.b32.xlu1 %v1684_v6, %s2072_s30 }
  0xf1   :  { %1971 = vrot.lane.b32.xlu0 %v1970_v13, %s2073_s3  ;;  %1859 = vmatprep.subr.bf16.mxu0 %v1858_v14 }
  0xf2   :  { %1861 = vmatpush3.bf16.msra.mxu0 %v1858_v14 }
  0xf3   :  { %190 = vrot.lane.b32.xlu1 %v1687_v11, %s2072_s30  ;;  %1871 = vmatprep.subr.bf16.mxu0 %v1870_v20 }
  0xf5   :  { %188 = vrot.lane.b32.xlu0 %v171_v12, %s2072_s30  ;;  %1697 = vmatmul.mubr.msk.f32.vlgmr.msra.gmra.mrb[4].mxu0 %vm196_vm2, %v52_v15 }
  0xf6   :  { %1699 = vmatprep.mubr.msk.f32.mxu0 %vm196_vm2, %v53_v16  ;;  %1873 = vmatpush3.bf16.msra.mxu0 %v1870_v20  ;;  %v2175_v20 = vld [vmem:[#allocation2 + $0x15b] ss:$0 sm:$0xff] }
  0xf7   :  { %1875 = vmatprep.subr.bf16.mxu0 %v1874_v34  ;;  %673 = vrot.lane.b32.xlu1 %v2138_v42, %s2073_s3 }
  0xf9   :  { %1700 = vmatmul.mubr.msk.f32.gmra.mrb[6].mxu0 %vm196_vm2, %v54_v17  ;;  %666 = vrot.lane.b32.xlu0 %v2138_v42, %s2072_s30 }
  0xfa   :  { %1877 = vmatpush3.bf16.msra.mxu0 %v1874_v34 }
  0xfb   :  { %1879 = vmatprep.subr.bf16.mxu0 %v1878_v37 }
  0xfd   :  { %680 = vrot.lane.b32.xlu0 %v2138_v42, %s2074_s0 }
 0x15d   :  { %v185_v43 = vpop.permute.xlu1 %184 }
 0x15f   :  { %v1967_v21 = vpop.permute.xlu0 %1966 }
 0x160   :  { %v1969_v22 = vunpack.i.h.bf16 %v1967_v21  ;;  %v1968_v23 = vunpack.i.l.bf16 %v1967_v21 }
 0x161   :  { %v187_v44 = vpop.permute.xlu1 %186 }
 0x162   :  { %v1862_v24 = vpack.c.bf16 %v1969_v22, %v1968_v23 }
 0x163   :  { %v1972_v25 = vpop.permute.xlu0 %1971 }
 0x164   :  { %v1974_v26 = vunpack.i.h.bf16 %v1972_v25  ;;  %v1973_v27 = vunpack.i.l.bf16 %v1972_v25  ;;  %1863 = vmatprep.subr.bf16.mxu1 %v1862_v24 }
 0x165   :  { %1865 = vmatpush3.bf16.msra.mxu1 %v1862_v24  ;;  %v191_v52 = vpop.permute.xlu1 %190 }
 0x166   :  { %v1866_v28 = vpack.c.bf16 %v1974_v26, %v1973_v27 }
 0x167   :  { %v189_v56 = vpop.permute.xlu0 %188 }
 0x168   :  { %1867 = vmatprep.subr.bf16.mxu1 %v1866_v28 }
 0x169   :  { %1869 = vmatpush3.bf16.msra.mxu1 %v1866_v28 }
 0x16c   :  { %1711 = vmatmul.mubr.msk.f32.vlgmr.msra.gmra.mrb[0].mxu1 %vm196_vm2, %v56_v29 }
 0x16d   :  { %1713 = vmatprep.mubr.msk.f32.mxu1 %vm196_vm2, %v57_v30 }
 0x170   :  { %1714 = vmatmul.mubr.msk.f32.gmra.mrb[2].mxu1 %vm196_vm2, %v58_v31 }
 0x171   :  { %1752 = vmatprep.mubr.msk.f32.mxu1 %vm196_vm2, %v59_v8 }
 0x1c8   :  { %v1698_v38 = vpop.f32.mrb[4].mxu0 }
 0x1c9   :  { %v275_v39 = vpop.f32.mrb[5].mxu0  ;;  %v281_v45 = vadd.f32 %v1698_v38, %v187_v44  ;;  %v63_v44 = vld [vmem:[#allocation2 + $0x128] sm:$0xff] }
 0x1ca   :  { %v276_v46 = vadd.f32 %v275_v39, %v185_v43 }
 0x1cc   :  { %v1701_v40 = vpop.f32.mrb[6].mxu0 }
 0x1cd   :  { %v285_v41 = vpop.f32.mrb[7].mxu0  ;;  %v291_v57 = vadd.f32 %v1701_v40, %v191_v52 }
 0x1ce   :  { %v286_v59 = vadd.f32 %v285_v41, %v189_v56 }
 0x23f   :  { %v1712_v48 = vpop.f32.mrb[0].mxu1 }
 0x240   :  { %v404_v49 = vadd.f32 %v1712_v48, %v281_v45  ;;  %v384_v51 = vpop.f32.mrb[1].mxu1  ;;  %v64_v45 = vld [vmem:[#allocation2 + $0x130] sm:$0xff] }
 0x241   :  { %v403_v53 = vadd.f32 %v384_v51, %v276_v46 }
 0x242   :  { %v2146_v58 = vadd.f32 %v404_v49, %v48_v47  ;;  %v1894_v47 = vpack.c.bf16 %v64_v45, %v63_v44 }
 0x243   :  { %v2148_v60 = vadd.f32 %v403_v53, %v47_v50  ;;  %v1715_v62 = vpop.f32.mrb[2].mxu1 }
 0x244   :  { %v406_v63 = vadd.f32 %v1715_v62, %v291_v57  ;;  %v394_v1 = vpop.f32.mrb[3].mxu1 }
 0x245   :  { %v1933_v3 = vpack.c.bf16 %v2146_v58, %v2148_v60  ;;  %v405_v4 = vadd.f32 %v394_v1, %v286_v59  ;;  %1724 = vmatprep.mubr.msk.f32.mxu0 %vm196_vm2, %v2148_v60 }
 0x246   :  { %v2154_v5 = vadd.f32 %v406_v63, %v50_v61  ;;  %1725 = vmatmul.mubr.msk.f32.vlgmr.msra.gmra.mrb[8].mxu0 %vm196_vm2, %v2146_v58 }
 0x247   :  { %v2158_v6 = vadd.f32 %v405_v4, %v49_v0  ;;  %1881 = vmatpush3.bf16.msra.mxu0 %v1878_v37 }
 0x248   :  { %1883 = vmatprep.subr.bf16.mxu0 %v1882_v2 }
 0x249   :  { %v1936_v7 = vpack.c.bf16 %v2154_v5, %v2158_v6  ;;  %1727 = vmatprep.mubr.msk.f32.mxu0 %vm196_vm2, %v2158_v6 }
 0x24a   :  { %1728 = vmatmul.mubr.msk.f32.gmra.mrb[10].mxu0 %vm196_vm2, %v2154_v5 }
 0x24b   :  { %1885 = vmatpush3.bf16.msra.mxu0 %v1882_v2  ;;  %1738 = vmatprep.mubr.msk.f32.mxu0 %vm196_vm2, %v2148_v60 }
 0x24c   :  { %1895 = vmatprep.subr.bf16.mxu0 %v1894_v47 }
 0x24e   :  { %1739 = vmatmul.mubr.msk.f32.vlgmr.msra.gmra.mrb[12].mxu0 %vm196_vm2, %v2146_v58  ;;  %v1586_v58 = vld [vmem:[#allocation2 + $0x159] ss:$0 sm:$0xff] }
 0x24f   :  { %1741 = vmatprep.mubr.msk.f32.mxu0 %vm196_vm2, %v2158_v6  ;;  %1897 = vmatpush3.bf16.msra.mxu0 %v1894_v47 }
 0x252   :  { %1742 = vmatmul.mubr.msk.f32.gmra.mrb[14].mxu0 %vm196_vm2, %v2154_v5 }
 0x319   :  { %v1726_v10 = vpop.f32.mrb[8].mxu0 }
 0x31a   :  { %v499_v11 = vadd.f32 %v1726_v10, %v1549_v9  ;;  %v493_v12 = vpop.f32.mrb[9].mxu0 }
 0x31b   :  { %v494_v13 = vadd.f32 %v1549_v9, %v493_v12 }
 0x31c   :  { %v1555_v14 = vmul.f32 -1.442695, %v499_v11 }
 0x31d   :  { %v1554_v15 = vmul.f32 -1.442695, %v494_v13  ;;  %v1729_v16 = vpop.f32.mrb[10].mxu0 }
 0x31e   :  { %1975 = vpow2.f32 %v1555_v14  ;;  %v509_v17 = vadd.f32 %v1729_v16, %v1549_v9  ;;  %v503_v18 = vpop.f32.mrb[11].mxu0  ;;  %v667_v14 = vpop.permute.xlu0 %666 }
 0x31f   :  { %1977 = vpow2.f32 %v1554_v15  ;;  %v504_v19 = vadd.f32 %v1549_v9, %v503_v18 }
 0x320   :  { %v1557_v21 = vmul.f32 -1.442695, %v509_v17 }
 0x321   :  { %v1556_v22 = vmul.f32 -1.442695, %v504_v19  ;;  %v1740_v23 = vpop.f32.mrb[12].mxu0 }
 0x322   :  { %1979 = vpow2.f32 %v1557_v21  ;;  %v616_v24 = vadd.f32 %v1740_v23, %v2175_v20  ;;  %v610_v25 = vpop.f32.mrb[13].mxu0 }
 0x323   :  { %1981 = vpow2.f32 %v1556_v22  ;;  %v611_v26 = vadd.f32 %v2175_v20, %v610_v25 }
 0x324   :  { %v1564_v27 = vmul.f32 -1.442695, %v616_v24 }
 0x325   :  { %v1563_v28 = vmul.f32 -1.442695, %v611_v26  ;;  %v1743_v29 = vpop.f32.mrb[14].mxu0 }
 0x326   :  { %1983 = vpow2.f32 %v1564_v27  ;;  %v626_v30 = vadd.f32 %v1743_v29, %v2175_v20  ;;  %v620_v31 = vpop.f32.mrb[15].mxu0  ;;  %v60_v27 = vld [vmem:[#allocation2 + $0x110] sm:$0xff]  ;;  %v62_v29 = vld [vmem:[#allocation2 + $0x120] sm:$0xff] }
 0x327   :  { %1985 = vpow2.f32 %v1563_v28  ;;  %v621_v32 = vadd.f32 %v2175_v20, %v620_v31  ;;  %v61_v28 = vld [vmem:[#allocation2 + $0x118] sm:$0xff]  ;;  %v66_v31 = vld [vmem:[#allocation2 + $0x140] sm:$0xff] }
 0x328   :  { %v1976_v33 = vpop.eup %1975  ;;  %v1566_v34 = vmul.f32 -1.442695, %v626_v30 }
 0x329   :  { %v1978_v35 = vpop.eup %1977  ;;  %v525_v36 = vadd.f32 1.0, %v1976_v33  ;;  %v1565_v37 = vmul.f32 -1.442695, %v621_v32 }
 0x32a   :  { %v524_v38 = vadd.f32 1.0, %v1978_v35  ;;  %1987 = vpow2.f32 %v1566_v34  ;;  %v681_v34 = vpop.permute.xlu0 %680 }
 0x32b   :  { %1989 = vrcp.f32 %v525_v36 }
 0x32c   :  { %v1980_v39 = vpop.eup %1979  ;;  %1991 = vrcp.f32 %v524_v38 }
 0x32d   :  { %v1982_v40 = vpop.eup %1981  ;;  %v527_v41 = vadd.f32 1.0, %v1980_v39  ;;  %1993 = vpow2.f32 %v1565_v37 }
 0x32e   :  { %v526_v43 = vadd.f32 1.0, %v1982_v40 }
 0x32f   :  { %1995 = vrcp.f32 %v527_v41 }
 0x330   :  { %v1984_v46 = vpop.eup %1983  ;;  %1997 = vrcp.f32 %v526_v43 }
 0x331   :  { %v1986_v48 = vpop.eup %1985  ;;  %v642_v49 = vadd.f32 1.0, %v1984_v46 }
 0x332   :  { %v641_v50 = vadd.f32 1.0, %v1986_v48 }
 0x333   :  { %1999 = vrcp.f32 %v642_v49 }
 0x334   :  { %v1988_v51 = vpop.eup %1987  ;;  %2001 = vrcp.f32 %v641_v50 }
 0x335   :  { %v1990_v52 = vpop.eup %1989  ;;  %v644_v53 = vadd.f32 1.0, %v1988_v51  ;;  %v67_v51 = vld [vmem:[#allocation2 + $0x148] sm:$0xf] }
 0x336   :  { %v1992_v54 = vpop.eup %1991  ;;  %v2181_v55 = vmul.f32 %v1990_v52, %v499_v11 }
 0x337   :  { %v1994_v56 = vpop.eup %1993  ;;  %v2183_v57 = vmul.f32 %v1992_v54, %v494_v13  ;;  %2003 = vrcp.f32 %v644_v53 }
 0x338   :  { %v643_v59 = vadd.f32 1.0, %v1994_v56  ;;  %1016 = vrot.lane.b32.xlu0 %v2181_v55, %s2073_s3 }
 0x339   :  { %v1996_v61 = vpop.eup %1995  ;;  %v1915_v62 = vpack.c.bf16 %v2181_v55, %v2183_v57  ;;  %1014 = vrot.lane.b32.xlu1 %v2183_v57, %s2073_s3  ;;  %v38_v55 = vld [vmem:[#allocation2 + $0x60] sm:$0xff] }
 0x33a   :  { %v1998_v63 = vpop.eup %1997  ;;  %v2191_v0 = vmul.f32 %v1996_v61, %v509_v17  ;;  %2005 = vrcp.f32 %v643_v59 }
 0x33b   :  { %v2193_v1 = vmul.f32 %v1998_v63, %v504_v19 }
 0x33c   :  { %1020 = vrot.lane.b32.xlu0 %v2191_v0, %s2073_s3 }
 0x33d   :  { %v2000_v2 = vpop.eup %1999  ;;  %v1918_v4 = vpack.c.bf16 %v2191_v0, %v2193_v1  ;;  %1018 = vrot.lane.b32.xlu1 %v2193_v1, %s2073_s3  ;;  %v41_v0 = vld [vmem:[#allocation2 + $0x78] sm:$0xff]  ;;  %v42_v1 = vld [vmem:[#allocation2 + $0x80] sm:$0xff] }
 0x33e   :  { %v2002_v8 = vpop.eup %2001  ;;  %v654_v9 = vmul.f32 %v2000_v2, %v616_v24 }
 0x33f   :  { %v653_v10 = vmul.f32 %v2002_v8, %v611_v26 }
 0x340   :  { %v662_v11 = vmul.f32 %v2138_v42, %v654_v9 }
 0x341   :  { %v2004_v12 = vpop.eup %2003  ;;  %v661_v13 = vmul.f32 %v2138_v42, %v653_v10  ;;  %1250 = vrot.lane.b32.xlu1 %v2175_v20, %s2072_s30 }
 0x342   :  { %v656_v15 = vmul.f32 %v2004_v12, %v626_v30  ;;  %v670_v16 = vadd.f32 %v667_v14, %v662_v11  ;;  %v65_v30 = vld [vmem:[#allocation2 + $0x138] sm:$0xff] }
 0x343   :  { %v669_v17 = vadd.f32 %v667_v14, %v661_v13 }
 0x344   :  { %v2006_v18 = vpop.eup %2005  ;;  %v664_v19 = vmul.f32 %v2138_v42, %v656_v15 }
 0x345   :  { %v655_v21 = vmul.f32 %v2006_v18, %v621_v32  ;;  %v1886_v22 = vpack.c.bf16 %v670_v16, %v669_v17  ;;  %v1898_v32 = vpack.c.bf16 %v66_v31, %v65_v30  ;;  %v2075_v30 = vmov 0.0|0.0  }
 0x346   :  { %v672_v24 = vadd.f32 %v667_v14, %v664_v19  ;;  %v2077_v31 = vmov 0.0  }
 0x347   :  { %v663_v23 = vmul.f32 %v2138_v42, %v655_v21  ;;  %1887 = vmatprep.subr.bf16.mxu1 %v1886_v22  ;;  %1899 = vmatprep.subr.bf16.mxu0 %v1898_v32  ;;  %v674_v42 = vpop.permute.xlu1 %673 }
 0x348   :  { %1889 = vmatpush3.bf16.msra.mxu1 %v1886_v22  ;;  %1901 = vmatpush3.bf16.msra.mxu0 %v1898_v32  ;;  %v677_v33 = vmul.f32 %v674_v42, %v654_v9  ;;  %v676_v35 = vmul.f32 %v674_v42, %v653_v10  ;;  %v679_v37 = vmul.f32 %v674_v42, %v656_v15 }
 0x349   :  { %v671_v25 = vadd.f32 %v667_v14, %v663_v23  ;;  %v678_v40 = vmul.f32 %v674_v42, %v655_v21  ;;  %1902 = vmatprep.subr.bf16.mxu0 %v2075_v30 }
 0x34a   :  { %v684_v36 = vadd.f32 %v681_v34, %v677_v33  ;;  %v683_v39 = vadd.f32 %v681_v34, %v676_v35  ;;  %v686_v45 = vadd.f32 %v681_v34, %v679_v37 }
 0x34b   :  { %v1890_v26 = vpack.c.bf16 %v672_v24, %v671_v25  ;;  %v685_v47 = vadd.f32 %v681_v34, %v678_v40 }
 0x34d   :  { %1891 = vmatprep.subr.bf16.mxu1 %v1890_v26 }
 0x34e   :  { %1893 = vmatpush3.bf16.msra.mxu1 %v1890_v26 }
 0x34f   :  { %1772 = vmatprep.subr.msk.mxu1 %vm91_vm0, %v67_v51 }
 0x351   :  { %1753 = vmatmul.mubr.msk.f32.vlgmr.msra.gmra.mrb[4].mxu1 %vm196_vm2, %v60_v27 }
 0x352   :  { %1755 = vmatprep.mubr.msk.f32.mxu1 %vm196_vm2, %v61_v28  ;;  %1773 = vmatpush3.msk.msra.mxu1 %vm91_vm0, %v67_v51 }
 0x353   :  { %1908 = vmatprep.subr.bf16.mxu1 %v2075_v30 }
 0x355   :  { %1756 = vmatmul.mubr.msk.f32.gmra.mrb[6].mxu1 %vm196_vm2, %v62_v29 }
 0x3aa   :  { %v1017_v32 = vpop.permute.xlu0 %1016 }
 0x3ab   :  { %v1015_v42 = vpop.permute.xlu1 %1014 }
 0x424   :  { %v1754_v38 = vpop.f32.mrb[4].mxu1 }
 0x425   :  { %v785_v41 = vmul.f32 %v1754_v38, %v684_v36  ;;  %v765_v43 = vpop.f32.mrb[5].mxu1  ;;  %v1021_v38 = vpop.permute.xlu0 %1020 }
 0x426   :  { %v784_v44 = vmul.f32 %v765_v43, %v683_v39 }
 0x428   :  { %v1757_v46 = vpop.f32.mrb[6].mxu1  ;;  %1766 = vmatprep.mubr.msk.f32.mxu0 %vm196_vm2, %v784_v44 }
 0x429   :  { %v787_v48 = vmul.f32 %v1757_v46, %v686_v45  ;;  %v775_v49 = vpop.f32.mrb[7].mxu1  ;;  %1767 = vmatmul.mubr.msk.f32.vlgmr.msra.gmra.mrb[16].mxu0 %vm196_vm2, %v785_v41  ;;  %v1019_v41 = vpop.permute.xlu1 %1018  ;;  %v35_v45 = vld [vmem:[#allocation2 + $0x48] sm:$0xff]  ;;  %v36_v46 = vld [vmem:[#allocation2 + $0x50] sm:$0xff] }
 0x42a   :  { %v786_v50 = vmul.f32 %v775_v49, %v685_v47  ;;  %v1921_v51 = vpack.c.bf16 %v36_v46, %v35_v45 }
 0x42c   :  { %1769 = vmatprep.mubr.msk.f32.mxu0 %vm196_vm2, %v786_v50  ;;  %v68_v50 = vld [vmem:[#allocation2 + $0x150] sm:$0x3] }
 0x42d   :  { %1770 = vmatmul.mubr.msk.f32.gmra.mrb[18].mxu0 %vm196_vm2, %v787_v48 }
 0x42e   :  { %1788 = vmatprep.mubr.msk.f32.mxu0 %vm2076_vm3, %v2077_v31 }
 0x4fc   :  { %v1768_v52 = vpop.f32.mrb[16].mxu0 }
 0x4fd   :  { %v886_v53 = vsel %vm78_vm1, %v1768_v52, -inf  ;;  %v866_v54 = vpop.f32.mrb[17].mxu0 }
 0x4fe   :  { %v885_v56 = vsel %vm78_vm1, %v866_v54, -inf }
 0x4ff   :  { %v889_v59 = vmax.f32 %v885_v56, %v886_v53  ;;  %v37_v53 = vld [vmem:[#allocation2 + $0x58] sm:$0xff] }
 0x500   :  { %v1771_v61 = vpop.f32.mrb[18].mxu0  ;;  %v1924_v57 = vpack.c.bf16 %v38_v55, %v37_v53 }
 0x501   :  { %v888_v63 = vsel %vm78_vm1, %v1771_v61, -inf  ;;  %v876_v2 = vpop.f32.mrb[19].mxu0 }
 0x502   :  { %v887_v8 = vsel %vm78_vm1, %v876_v2, -inf }
 0x503   :  { %v890_v9 = vmax.f32 %v887_v8, %v888_v63 }
 0x505   :  { %v891_v10 = vmax.f32 %v889_v59, %v890_v9 }
 0x507   :  { %v892_v11 = vrot.slane %v891_v10, 4 }
 0x509   :  { %v893_v12 = vmax.f32 %v891_v10, %v892_v11 }
 0x50b   :  { %v894_v13 = vrot.slane %v893_v12, 2 }
 0x50d   :  { %v895_v14 = vmax.f32 %v893_v12, %v894_v13  ;;  %v1251_v13 = vpop.permute.xlu1 %1250 }
 0x50f   :  { %v896_v15 = vrot.slane %v895_v14, 1 }
 0x511   :  { %v897_v16 = vmax.f32 %v895_v14, %v896_v15 }
 0x513   :  { %v898_v17 = vsub.f32 %v866_v54, %v897_v16  ;;  %v899_v18 = vsub.f32 %v1768_v52, %v897_v16  ;;  %v900_v19 = vsub.f32 %v876_v2, %v897_v16  ;;  %v901_v21 = vsub.f32 %v1771_v61, %v897_v16  ;;  %v69_v52 = vld [vmem:[#allocation2 + $0x152] sm:$0x3] }
 0x514   :  { %v40_v54 = vld [vmem:[#allocation2 + $0x70] sm:$0xff] }
 0x515   :  { %v902_v22 = vmul.f32 1.442695, %v898_v17  ;;  %v904_v23 = vmul.f32 1.442695, %v899_v18  ;;  %v906_v24 = vmul.f32 1.442695, %v900_v19 }
 0x516   :  { %v908_v25 = vmul.f32 1.442695, %v901_v21 }
 0x517   :  { %2007 = vpow2.f32 %v902_v22 }
 0x518   :  { %2009 = vpow2.f32 %v904_v23 }
 0x519   :  { %2011 = vpow2.f32 %v906_v24 }
 0x51a   :  { %2013 = vpow2.f32 %v908_v25 }
 0x521   :  { %v2008_v26 = vpop.eup %2007 }
 0x522   :  { %v2010_v27 = vpop.eup %2009  ;;  %1774 = vmatprep.mubr.msk.f32.mxu1 %vm78_vm1, %v2008_v26 }
 0x523   :  { %v2012_v28 = vpop.eup %2011  ;;  %1775 = vmatmul.mubr.msk.f32.vlgmr.msra.gmra.mrb[8].mxu1 %vm78_vm1, %v2010_v27 }
 0x524   :  { %1777 = vmatprep.mubr.msk.f32.mxu1 %vm78_vm1, %v2012_v28  ;;  %v2014_v29 = vpop.eup %2013 }
 0x527   :  { %1778 = vmatmul.mubr.msk.f32.gmra.mrb[10].mxu1 %vm78_vm1, %v2014_v29 }
 0x528   :  { %1799 = vmatprep.mubr.msk.f32.mxu1 %vm2076_vm3, %v2077_v31 }
 0x5f6   :  { %v1776_v33 = vpop.f32.mrb[8].mxu1 }
 0x5f7   :  { %v1027_v34 = vmul.f32 %v1776_v33, %v1017_v32  ;;  %v991_v35 = vpop.f32.mrb[9].mxu1 }
 0x5f8   :  { %v1026_v36 = vmul.f32 %v1015_v42, %v991_v35  ;;  %v1909_v37 = vpack.c.bf16 %v1776_v33, %v991_v35  ;;  %v43_v42 = vld [vmem:[#allocation2 + $0x88] sm:$0xff]  ;;  %v44_v33 = vld [vmem:[#allocation2 + $0x90] sm:$0xff]  ;;  %v45_v35 = vld [vmem:[#allocation2 + $0x98] sm:$0xff] }
 0x5fa   :  { %v1903_v39 = vpack.c.bf16 %v1027_v34, %v1026_v36  ;;  %v1779_v40 = vpop.f32.mrb[10].mxu1  ;;  %1910 = vmatpush3.bf16.msra.mxu1 %v1909_v37  ;;  %v1939_v34 = vpack.c.bf16 %v44_v33, %v43_v42  ;;  %v46_v36 = vld [vmem:[#allocation2 + $0xa0] sm:$0xff] }
 0x5fb   :  { %v1029_v43 = vmul.f32 %v1779_v40, %v1021_v38  ;;  %v1001_v44 = vpop.f32.mrb[11].mxu1  ;;  %1911 = vmatprep.subr.bf16.mxu1 %v2075_v30  ;;  %v1942_v37 = vpack.c.bf16 %v46_v36, %v45_v35 }
 0x5fc   :  { %v1028_v47 = vmul.f32 %v1019_v41, %v1001_v44  ;;  %v1912_v48 = vpack.c.bf16 %v1779_v40, %v1001_v44  ;;  %1904 = vmatpush3.bf16.msra.mxu0 %v1903_v39 }
 0x5fd   :  { %1905 = vmatprep.subr.bf16.mxu0 %v2075_v30 }
 0x5fe   :  { %v1906_v49 = vpack.c.bf16 %v1029_v43, %v1028_v47  ;;  %1913 = vmatpush3.bf16.msra.mxu1 %v1912_v48 }
 0x5ff   :  { %1920 = vmatprep.subr.bf16.mxu1 %v2075_v30 }
 0x600   :  { %1907 = vmatpush3.bf16.msra.mxu0 %v1906_v49 }
 0x601   :  { %1800 = vmatmul.mubr.msk.f32.vlgmr.msra.gmra.mrb[12].mxu1 %vm196_vm2, %v68_v50  ;;  %1914 = vmatprep.subr.bf16.mxu0 %v2075_v30 }
 0x602   :  { %1922 = vmatpush3.bf16.msra.mxu1 %v1921_v51  ;;  %1829 = vmatprep.mubr.msk.f32.mxu1 %vm2076_vm3, %v2077_v31 }
 0x603   :  { %1789 = vmatmul.mubr.msk.f32.vlgmr.msra.gmra.mrb[20].mxu0 %vm196_vm2, %v68_v50  ;;  %1923 = vmatprep.subr.bf16.mxu1 %v2075_v30 }
 0x604   :  { %1916 = vmatpush3.bf16.msra.mxu0 %v1915_v62  ;;  %1810 = vmatprep.mubr.msk.f32.mxu0 %vm2076_vm3, %v2077_v31  ;;  %v39_v62 = vld [vmem:[#allocation2 + $0x68] sm:$0xff] }
 0x605   :  { %1917 = vmatprep.subr.bf16.mxu0 %v2075_v30  ;;  %v1927_v56 = vpack.c.bf16 %v40_v54, %v39_v62 }
 0x606   :  { %1925 = vmatpush3.bf16.msra.mxu1 %v1924_v57 }
 0x607   :  { %1926 = vmatprep.subr.bf16.mxu1 %v2075_v30 }
 0x608   :  { %1919 = vmatpush3.bf16.msra.mxu0 %v1918_v4  ;;  %v1930_v4 = vpack.c.bf16 %v42_v1, %v41_v0 }
 0x609   :  { %1938 = vmatprep.subr.bf16.mxu0 %v2075_v30 }
 0x60a   :  { %1928 = vmatpush3.bf16.msra.mxu1 %v1927_v56 }
 0x60b   :  { %1811 = vmatmul.mubr.msk.f32.vlgmr.msra.gmra.mrb[22].mxu0 %vm196_vm2, %v69_v52  ;;  %1929 = vmatprep.subr.bf16.mxu1 %v2075_v30 }
 0x60c   :  { %1851 = vmatprep.mubr.msk.f32.mxu0 %vm2076_vm3, %v2077_v31  ;;  %1940 = vmatpush3.bf16.msra.mxu0 %v1939_v34 }
 0x60d   :  { %1941 = vmatprep.subr.bf16.mxu0 %v2075_v30 }
 0x60e   :  { %1931 = vmatpush3.bf16.msra.mxu1 %v1930_v4 }
 0x60f   :  { %1932 = vmatprep.subr.bf16.mxu1 %v2075_v30 }
 0x610   :  { %1943 = vmatpush3.bf16.msra.mxu0 %v1942_v37 }
 0x6d4   :  { %v1169_v59 = vpop.f32.mrb[12].mxu1 }
 0x6d5   :  { %2015 = vrcp.f32 %v1169_v59  ;;  %v1801_v61 = vpop.f32.mrb[13].mxu1 }
 0x6d6   :  { %v1099_v63 = vpop.f32.mrb[20].mxu0 }
 0x6d7   :  { %v1790_v2 = vpop.f32.mrb[21].mxu0 }
 0x6de   :  { %v1242_v8 = vpop.f32.mrb[22].mxu0 }
 0x6df   :  { %v2016_v9 = vpop.eup %2015  ;;  %v1246_v10 = vmul.f32 %v1242_v8, %v1099_v63  ;;  %v1812_v11 = vpop.f32.mrb[23].mxu0 }
 0x6e1   :  { %v1248_v12 = vmul.f32 %v2016_v9, %v1246_v10 }
 0x6e3   :  { %1830 = vmatmul.mubr.msk.f32.vlgmr.msra.gmra.mrb[14].mxu1 %vm1253_vm4, %v1248_v12 }
 0x6e4   :  { %1934 = vmatpush3.bf16.msra.mxu1 %v1933_v3  ;;  %1840 = vmatprep.mubr.msk.f32.mxu1 %vm2076_vm3, %v2077_v31 }
 0x6e5   :  { %1935 = vmatprep.subr.bf16.mxu1 %v2075_v30 }
 0x6e8   :  { %1937 = vmatpush3.bf16.msra.mxu1 %v1936_v7 }
 0x6eb   :  { %1841 = vmatmul.mubr.msk.f32.vlgmr.msra.gmra.mrb[14].mxu1 %vm196_vm2, %v69_v52 }
 0x7be   :  { %v1393_v14 = vpop.f32.mrb[14].mxu1 }
 0x7bf   :  { %v1952_v15 = vadd.f32 %v1393_v14, %v1251_v13  ;;  %v1842_v16 = vpop.f32.mrb[15].mxu1 }
 0x7c1   :  { %v1398_v17 = vsel %vm1397_vm5, %v1952_v15, 0.0 }
 0x7c2   :  { %1399 = vadd.xlane.f32.xlu0 %v1398_v17 }
 0x7d8   :  { %1418 = vrot.lane.b32.xlu0 %v1586_v58, %s2072_s30 }
 0x7dc   :  { %1439 = vrot.lane.b32.xlu0 %v1586_v58, %s2074_s0 }
 0x7e0   :  { %1443 = vrot.lane.b32.xlu0 %v2175_v20, %s2073_s3 }
 0x84f   :  { %v1400_v60 = vpop.xlane.xlu0 %1399 }
 0x850   :  { %v1402_v3 = vmul.f32 0.03125, %v1400_v60 }
 0x852   :  { %v1403_v5 = vsub.f32 %v1952_v15, %v1402_v3 }
 0x853   :  { %v1419_v24 = vpop.permute.xlu0 %1418 }
 0x854   :  { %v1404_v6 = vmul.f32 %v1403_v5, %v1403_v5 }
 0x856   :  { %v1405_v7 = vsel %vm1397_vm5, %v1404_v6, 0.0 }
 0x857   :  { %1406 = vadd.xlane.f32.xlu1 %v1405_v7  ;;  %v1440_v45 = vpop.permute.xlu0 %1439 }
 0x85b   :  { %v1444_v48 = vpop.permute.xlu0 %1443 }
 0x8e4   :  { %v1407_v18 = vpop.xlane.xlu1 %1406 }
 0x8e5   :  { %v1408_v19 = vmul.f32 0.03125, %v1407_v18 }
 0x8e7   :  { %v1409_v21 = vadd.f32 1e-05, %v1408_v19 }
 0x8e9   :  { %2017 = vrsqrt.f32 %v1409_v21 }
 0x8f3   :  { %v2018_v22 = vpop.eup %2017 }
 0x8f4   :  { %v1411_v23 = vmul.f32 %v2018_v22, %v1403_v5 }
 0x8f6   :  { %v1416_v25 = vmul.f32 %v1586_v58, %v1411_v23 }
 0x8f8   :  { %v1421_v26 = vadd.f32 %v1419_v24, %v1416_v25 }
 0x8fa   :  { %v1422_v27 = vsel %vm1397_vm5, %v1421_v26, 0.0 }
 0x8fb   :  { %1423 = vadd.xlane.f32.xlu1 %v1422_v27 }
 0x988   :  { %v1424_v20 = vpop.xlane.xlu1 %1423 }
 0x989   :  { %v1425_v28 = vmul.f32 0.03125, %v1424_v20 }
 0x98b   :  { %v1426_v29 = vsub.f32 %v1421_v26, %v1425_v28 }
 0x98d   :  { %v1427_v31 = vmul.f32 %v1426_v29, %v1426_v29 }
 0x98f   :  { %v1428_v32 = vsel %vm1397_vm5, %v1427_v31, 0.0 }
 0x990   :  { %1429 = vadd.xlane.f32.xlu1 %v1428_v32 }
 0x9a1   :  { %1435 = vrot.lane.b32.xlu1 %v1586_v58, %s2073_s3 }
 0xa1d   :  { %v1430_v38 = vpop.xlane.xlu1 %1429 }
 0xa1e   :  { %v1431_v39 = vmul.f32 0.03125, %v1430_v38 }
 0xa20   :  { %v1432_v40 = vadd.f32 1e-05, %v1431_v39 }
 0xa21   :  { %v1436_v43 = vpop.permute.xlu1 %1435 }
 0xa22   :  { %2019 = vrsqrt.f32 %v1432_v40 }
 0xa2c   :  { %v2020_v41 = vpop.eup %2019 }
 0xa2d   :  { %v1434_v44 = vmul.f32 %v2020_v41, %v1426_v29 }
 0xa2f   :  { %v1438_v46 = vmul.f32 %v1436_v43, %v1434_v44 }
 0xa31   :  { %v1442_v47 = vadd.f32 %v1440_v45, %v1438_v46 }
 0xa33   :  { %1852 = vmatmul.mubr.msk.f32.vlgmr.msra.gmra.mrb[24].mxu0 %vm196_vm2, %v1442_v47 }
 0xb06   :  { %v1515_v30 = vpop.f32.mrb[24].mxu0 }
 0xb07   :  { %v1516_v49 = vadd.f32 %v1515_v30, %v1444_v48  ;;  %v1853_v50 = vpop.f32.mrb[25].mxu0 }
 0xb09   :  { %1520 = vst.msk [vmem:[#allocation5] sm:$0x3] %vm1519_vm6, %v1516_v49 }
 0xb0a   :  { %2054 = shalt.err (!%p2051_p12)
}
 0xb0b   :  { %s2055_s9 = scalar_lea.hbm %s2290_s2, 32 }
 0xb0c   :  { %p2056_p13 = scmp.ne.s32.totalorder %s2290_s2, %s2055_s9  ;;  %p2059_p0 = scmp.lt.u32.totalorder %s2055_s9, %s2290_s2 }
 0xb0e   :  { %p2061_p1 = pnand %p2059_p0, %p2056_p13 }
 0xb10   :  { %2064 = shalt.err (!%p2061_p1)
}
 0xb11   :  { %1530 = dma.vmem_to_hbm [thread:$0]  %s1528_s5, 32, %s2290_s2, [#allocation4]  }
 0xb12   :  { %2067 = dma.done.wait [#allocation4], 32  }
 0xb13   :  { %2068 = vsyncadd [#allocation4], 4294967264 }
 0xb14   :  { %1534 = vsyncpa [#allocation3], 1 }
 0xb15   :  { %1535 = vsyncpa [#allocation4], 1 }

</bundles_post_ra>
